<compile_context>
chip_gen: v7x
topology: tpu7x:2x2x1
jax: 0.10.0
libtpu: 0.0.40
codegen_flags: <defaults>
</compile_context>

<pallas_src>
import math
from functools import lru_cache, partial

import jax
import jax.numpy as jnp
from jax.experimental import pallas as pl
from jax.experimental.pallas import tpu as pltpu


# ----------------------------------------------------------------------------
# Tile / budget helpers
# ----------------------------------------------------------------------------
def _round_up(x, m):
    return ((x + m - 1) // m) * m


def _pick_tile(dim, target, align=128):
    """Largest multiple of `align` <= target that divides dim; small dims use the full dim."""
    if dim <= target:
        return dim
    t = (target // align) * align
    while t >= align:
        if dim % t == 0:
            return t
        t -= align
    return dim


def _tile_and_pad(dim, target, align=128):
    """(tile, padded_dim). Pads to a 128-multiple instead of one giant un-tiled block."""
    if dim <= target:
        return dim, dim
    dim_p = dim if dim % align == 0 else _round_up(dim, align)
    return _pick_tile(dim_p, target, align), dim_p


def _mha_seq_tiles(S, tq_target, tk_target, align=128):
    """(tq, tk, S_pad) for the attention sequence axis."""
    if S <= min(tq_target, tk_target):
        return S, S, S
    S_pad = S if S % align == 0 else _round_up(S, align)
    return (_pick_tile(S_pad, tq_target, align),
            _pick_tile(S_pad, tk_target, align),
            S_pad)


def _tpu_vmem_bytes():
    try:
        info = pltpu.get_tpu_info()
        for attr in ("vmem_capacity_bytes", "vmem_bytes", "vmem_capacity"):
            v = getattr(info, attr, None)
            if v:
                return int(v)
    except Exception:
        pass
    return 64 << 20  # conservative (v7x-sized) fallback


@lru_cache(maxsize=None)
def _budgets():
    """(vmem_limit_bytes, projection tile targets, attention tile targets)."""
    vmem = _tpu_vmem_bytes()
    big = vmem >= (96 << 20)                        # v5e/v6e: 128 MiB; v7x: 64 MiB
    vmem_limit = int(min(vmem * 3 // 4, 100 << 20))
    proj = dict(tm_target=1024 if big else 512, tn_target=512, tk_target=512)
    attn = dict(tq_target=256, tk_target=512 if big else 256)
    return vmem_limit, proj, attn


# ----------------------------------------------------------------------------
# Fused Q/K/V projection kernel (tiled, K-accumulated, bf16 MXU / f32 acc).
#   y_q = (x_q @ WqT + bq) * q_scale ; y_k = x_k @ WkT + bk ; y_v = x_v @ WvT + bv
# ----------------------------------------------------------------------------
def _qkv_proj_kernel(*refs, q_scale, shared, compute_dtype):
    if shared:
        (x_ref, wq_ref, wk_ref, wv_ref,
         bq_ref, bk_ref, bv_ref,
         q_ref, k_ref, v_ref,
         accq, acck, accv) = refs
    else:
        (xq_ref, xk_ref, xv_ref,
         wq_ref, wk_ref, wv_ref,
         bq_ref, bk_ref, bv_ref,
         q_ref, k_ref, v_ref,
         accq, acck, accv) = refs

    kstep = pl.program_id(2)

    @pl.when(kstep == 0)
    def _init():
        accq[...] = jnp.zeros_like(accq)
        acck[...] = jnp.zeros_like(acck)
        accv[...] = jnp.zeros_like(accv)

    if shared:
        xq = x_ref[...].astype(compute_dtype)
        xk = xv = xq
    else:
        xq = xq_ref[...].astype(compute_dtype)
        xk = xk_ref[...].astype(compute_dtype)
        xv = xv_ref[...].astype(compute_dtype)

    accq[...] += jnp.dot(xq, wq_ref[...].astype(compute_dtype),
                         preferred_element_type=jnp.float32)
    acck[...] += jnp.dot(xk, wk_ref[...].astype(compute_dtype),
                         preferred_element_type=jnp.float32)
    accv[...] += jnp.dot(xv, wv_ref[...].astype(compute_dtype),
                         preferred_element_type=jnp.float32)

    @pl.when(kstep == pl.num_programs(2) - 1)
    def _fin():
        # 1/sqrt(d_k) folded into the Q finalize (applied in f32 before the store cast).
        q_ref[...] = ((accq[...] + bq_ref[...]) * q_scale).astype(q_ref.dtype)
        k_ref[...] = (acck[...] + bk_ref[...]).astype(k_ref.dtype)
        v_ref[...] = (accv[...] + bv_ref[...]).astype(v_ref.dtype)


def qkv_proj_pallas(xq, xk, xv, wtq, bq, wtk, bk, wtv, bv, q_scale, *,
                    out_dtype, compute_dtype, vmem_limit,
                    tm_target, tn_target, tk_target):
    """xq/xk/xv: [M, D_in]; wt*: [D_in, D_out] pre-transposed; b*: [D_out]."""
    shared = (xk is xq) and (xv is xq)       # self-attention fast path: stream x once
    m, d_in = xq.shape
    d_out = wtq.shape[1]
    tm, m_pad = _tile_and_pad(m, tm_target)
    tn = _pick_tile(d_out, tn_target)        # TODO(synk): pad large non-128-aligned d_model
    tk = _pick_tile(d_in, tk_target)
    if m_pad != m:
        padcfg = [(0, m_pad - m), (0, 0)]
        xq = jnp.pad(xq, padcfg)
        if shared:
            xk = xv = xq
        else:
            xk = jnp.pad(xk, padcfg)
            xv = jnp.pad(xv, padcfg)
    grid = (m_pad // tm, d_out // tn, d_in // tk)

    x_spec = pl.BlockSpec((tm, tk), lambda i, j, k: (i, k))
    w_spec = pl.BlockSpec((tk, tn), lambda i, j, k: (k, j))
    b_spec = pl.BlockSpec((1, tn), lambda i, j, k: (0, j))
    o_spec = pl.BlockSpec((tm, tn), lambda i, j, k: (i, j))
    out_sds = jax.ShapeDtypeStruct((m_pad, d_out), out_dtype)

    if shared:
        in_specs = [x_spec] + [w_spec] * 3 + [b_spec] * 3
        call_args = (xq, wtq, wtk, wtv,
                     bq.reshape(1, -1), bk.reshape(1, -1), bv.reshape(1, -1))
    else:
        in_specs = [x_spec] * 3 + [w_spec] * 3 + [b_spec] * 3
        call_args = (xq, xk, xv, wtq, wtk, wtv,
                     bq.reshape(1, -1), bk.reshape(1, -1), bv.reshape(1, -1))

    n_x = 1 if shared else 3
    flops = 3 * 2 * m_pad * d_out * d_in
    bytes_acc = (n_x * (d_out // tn) * m_pad * d_in * xq.dtype.itemsize
                 + 3 * (m_pad // tm) * d_in * d_out * wtq.dtype.itemsize
                 + 3 * d_out * 4
                 + 3 * m_pad * d_out * jnp.dtype(out_dtype).itemsize)

    q2, k2, v2 = pl.pallas_call(
        partial(_qkv_proj_kernel, q_scale=q_scale, shared=shared,
                compute_dtype=compute_dtype),
        out_shape=(out_sds, out_sds, out_sds),
        grid_spec=pltpu.PrefetchScalarGridSpec(
            num_scalar_prefetch=0,
            grid=grid,
            in_specs=in_specs,
            out_specs=(o_spec, o_spec, o_spec),
            scratch_shapes=[pltpu.VMEM((tm, tn), jnp.float32)] * 3,
        ),
        compiler_params=pltpu.CompilerParams(
            dimension_semantics=("parallel", "parallel", "arbitrary"),
            vmem_limit_bytes=vmem_limit,
        ),
        cost_estimate=pl.CostEstimate(
            flops=int(flops), transcendentals=0, bytes_accessed=int(bytes_acc)),
    )(*call_args)

    if m_pad != m:
        q2, k2, v2 = q2[:m], k2[:m], v2[:m]
    return q2, k2, v2


# ----------------------------------------------------------------------------
# Single tiled linear kernel (output projection):  y = x @ Wt + b
# ----------------------------------------------------------------------------
def _linear_kernel(x_ref, wt_ref, b_ref, o_ref, acc_ref, *, compute_dtype):
    kstep = pl.program_id(2)

    @pl.when(kstep == 0)
    def _init():
        acc_ref[...] = jnp.zeros_like(acc_ref)

    acc_ref[...] += jnp.dot(x_ref[...].astype(compute_dtype),
                            wt_ref[...].astype(compute_dtype),
                            preferred_element_type=jnp.float32)

    @pl.when(kstep == pl.num_programs(2) - 1)
    def _fin():
        o_ref[...] = (acc_ref[...] + b_ref[...]).astype(o_ref.dtype)


def linear_pallas(x, wt, b, *, out_dtype, compute_dtype, vmem_limit,
                  tm_target, tn_target, tk_target):
    m, d_in = x.shape
    d_out = wt.shape[1]
    tm, m_pad = _tile_and_pad(m, tm_target)
    tn = _pick_tile(d_out, tn_target)
    tk = _pick_tile(d_in, tk_target)
    if m_pad != m:
        x = jnp.pad(x, [(0, m_pad - m), (0, 0)])
    grid = (m_pad // tm, d_out // tn, d_in // tk)

    flops = 2 * m_pad * d_out * d_in
    bytes_acc = ((d_out // tn) * m_pad * d_in * x.dtype.itemsize
                 + (m_pad // tm) * d_in * d_out * wt.dtype.itemsize
                 + d_out * 4
                 + m_pad * d_out * jnp.dtype(out_dtype).itemsize)

    out = pl.pallas_call(
        partial(_linear_kernel, compute_dtype=compute_dtype),
        out_shape=jax.ShapeDtypeStruct((m_pad, d_out), out_dtype),
        grid_spec=pltpu.PrefetchScalarGridSpec(
            num_scalar_prefetch=0,
            grid=grid,
            in_specs=[
                pl.BlockSpec((tm, tk), lambda i, j, k: (i, k)),
                pl.BlockSpec((tk, tn), lambda i, j, k: (k, j)),
                pl.BlockSpec((1, tn), lambda i, j, k: (0, j)),
            ],
            out_specs=pl.BlockSpec((tm, tn), lambda i, j, k: (i, j)),
            scratch_shapes=[pltpu.VMEM((tm, tn), jnp.float32)],
        ),
        compiler_params=pltpu.CompilerParams(
            dimension_semantics=("parallel", "parallel", "arbitrary"),
            vmem_limit_bytes=vmem_limit,
        ),
        cost_estimate=pl.CostEstimate(
            flops=int(flops), transcendentals=0, bytes_accessed=int(bytes_acc)),
    )(x, wt, b.reshape(1, -1))
    return out[:m] if m_pad != m else out


# ----------------------------------------------------------------------------
# Flash-style attention.  Inputs are per-head: q/k/v [B*H, S, d_k] (1/sqrt(d_k)
# already folded into q).  mask (optional): [B, S, S], nonzero == attend,
# fill-then-softmax semantics (masked scores filled with mask_eps).
# Grid (B*H, S/tq, S/tk); KV axis last + "arbitrary"; online softmax in f32.
# ----------------------------------------------------------------------------
def _make_mha_kernel(*, use_mask, mask_eps, compute_dtype, nq, nk, n_heads,
                     s_orig, tk, need_key_pad):
    def kernel(*refs):
        if use_mask:
            (summ_ref, q_ref, k_ref, v_ref, mask_ref, o_ref,
             m_sc, l_sc, acc_sc) = refs
        else:
            (q_ref, k_ref, v_ref, o_ref, m_sc, l_sc, acc_sc) = refs

        kv_step = pl.program_id(2)

        @pl.when(kv_step == 0)
        def _init():
            m_sc[...] = jnp.full_like(m_sc, -jnp.inf)
            l_sc[...] = jnp.zeros_like(l_sc)
            acc_sc[...] = jnp.zeros_like(acc_sc)

        def _update():
            q = q_ref[0].astype(compute_dtype)       # [tq, d_k]
            k = k_ref[0].astype(compute_dtype)       # [tk, d_k]
            # scores[i, j] = sum_d q[i, d] * k[j, d]  (no explicit transpose)
            s = jax.lax.dot_general(q, k, (((1,), (1,)), ((), ())),
                                    preferred_element_type=jnp.float32)
            if use_mask:
                # fill-then-softmax (torch masked_fill(mask == 0, mask_eps))
                s = jnp.where(mask_ref[0] == 0, mask_eps, s)
            if need_key_pad:
                col = kv_step * tk + jax.lax.broadcasted_iota(jnp.int32, s.shape, 1)
                s = jnp.where(col < s_orig, s, -jnp.inf)   # padded keys never contribute

            m_prev = m_sc[...]
            m_new = jnp.maximum(m_prev, jnp.max(s, axis=-1, keepdims=True))
            alpha = jnp.exp(m_prev - m_new)
            p = jnp.exp(s - m_new)
            l_sc[...] = alpha * l_sc[...] + jnp.sum(p, axis=-1, keepdims=True)
            acc_sc[...] = alpha * acc_sc[...] + jnp.dot(
                p.astype(compute_dtype), v_ref[0].astype(compute_dtype),
                preferred_element_type=jnp.float32)
            m_sc[...] = m_new

        if use_mask:
            # block summary: 0 = fully masked (skip), 1 = partial, 2 = fully unmasked
            b = pl.program_id(0) // n_heads
            blk = summ_ref[b * (nq * nk) + pl.program_id(1) * nk + kv_step]
            pl.when(blk > 0)(_update)
        else:
            _update()

        @pl.when(kv_step == pl.num_programs(2) - 1)
        def _fin():
            l = l_sc[...]
            if use_mask:
                l = jnp.where(l > 0.0, l, 1.0)        # rows whose blocks were all skipped
            o_ref[0] = (acc_sc[...] * pl.reciprocal(l, approx=True)).astype(o_ref.dtype)

    return kernel


def mha_pallas(q, k, v, mask, *, n_heads, mask_eps, compute_dtype, vmem_limit,
               tq_target=256, tk_target=512):
    """q/k/v: [B*H, S, d_k]; mask: [B, S, S] or None -> [B*H, S, d_k]."""
    BH, S, d_k = q.shape
    B = BH // n_heads
    use_mask = mask is not None

    tq, tk, S_pad = _mha_seq_tiles(S, tq_target, tk_target)
    need_pad = S_pad != S
    if need_pad:
        padcfg = [(0, 0), (0, S_pad - S), (0, 0)]
        q = jnp.pad(q, padcfg)
        k = jnp.pad(k, padcfg)
        v = jnp.pad(v, padcfg)
    nq, nk = S_pad // tq, S_pad // tk
    grid = (BH, nq, nk)

    def _spec(shape, imap3):
        if use_mask:   # scalar-prefetch ref is passed as an extra trailing index_map arg
            return pl.BlockSpec(shape, lambda bh, qi, ki, summ: imap3(bh, qi, ki))
        return pl.BlockSpec(shape, imap3)

    q_spec = _spec((1, tq, d_k), lambda bh, qi, ki: (bh, qi, 0))
    kv_spec = _spec((1, tk, d_k), lambda bh, qi, ki: (bh, ki, 0))
    o_spec = _spec((1, tq, d_k), lambda bh, qi, ki: (bh, qi, 0))

    in_specs = [q_spec, kv_spec, kv_spec]
    args = [q, k, v]
    num_prefetch = 0
    if use_mask:
        m8 = (mask != 0).astype(jnp.int8)
        if need_pad:
            m8 = jnp.pad(m8, [(0, 0), (0, S_pad - S), (0, S_pad - S)])
        # per-(b, q-block, kv-block) summary (0/1/2), flattened for cheap SMEM residency
        mb = m8.reshape(B, nq, tq, nk, tk) != 0
        summary = (mb.any(axis=(2, 4)).astype(jnp.int32)
                   + mb.all(axis=(2, 4)).astype(jnp.int32)).reshape(-1)
        in_specs.append(
            _spec((1, tq, tk), lambda bh, qi, ki: (bh // n_heads, qi, ki)))
        args = [summary] + args + [m8]
        num_prefetch = 1

    kernel = _make_mha_kernel(
        use_mask=use_mask, mask_eps=mask_eps, compute_dtype=compute_dtype,
        nq=nq, nk=nk, n_heads=n_heads, s_orig=S, tk=tk, need_key_pad=need_pad)

    esize = q.dtype.itemsize
    flops = 4 * BH * S_pad * S_pad * d_k
    transc = BH * S_pad * S_pad
    bytes_acc = (BH * S_pad * d_k * esize                 # q
                 + 2 * nq * BH * S_pad * d_k * esize      # k, v re-streamed per q block
                 + (B * S_pad * S_pad if use_mask else 0)
                 + BH * S_pad * d_k * esize)              # out

    out = pl.pallas_call(
        kernel,
        out_shape=jax.ShapeDtypeStruct((BH, S_pad, d_k), q.dtype),
        grid_spec=pltpu.PrefetchScalarGridSpec(
            num_scalar_prefetch=num_prefetch,
            grid=grid,
            in_specs=in_specs,
            out_specs=o_spec,
            scratch_shapes=[
                pltpu.VMEM((tq, 1), jnp.float32),      # running max m
                pltpu.VMEM((tq, 1), jnp.float32),      # running denom l
                pltpu.VMEM((tq, d_k), jnp.float32),    # running output acc
            ],
        ),
        compiler_params=pltpu.CompilerParams(
            dimension_semantics=("parallel", "parallel", "arbitrary"),
            vmem_limit_bytes=vmem_limit,
        ),
        cost_estimate=pl.CostEstimate(
            flops=int(flops), transcendentals=int(transc),
            bytes_accessed=int(bytes_acc)),
    )(*args)

    return out[:, :S, :] if need_pad else out


# ----------------------------------------------------------------------------
# Parameters (weights pre-transposed + pre-cast to the MXU dtype ONCE) & forward.
# ----------------------------------------------------------------------------
def init_params(key, n_heads, d_model, mxu_dtype=jnp.bfloat16):
    assert d_model % n_heads == 0, "incompatible `d_model` and `n_heads`"
    params = []
    bound = 1.0 / math.sqrt(d_model)
    for _ in range(4):
        key, kw, kb = jax.random.split(key, 3)
        w = jax.random.uniform(kw, (d_model, d_model), jnp.float32, -bound, bound)
        b = jax.random.uniform(kb, (d_model,), jnp.float32, -bound, bound)
        wt = jnp.asarray(w.T)                          # nn.Linear: x @ W.T + b
        params.append({"wt": wt, "wt_mxu": wt.astype(mxu_dtype), "b": b})
    return params


def abstract_attention_forward(params, query, key, value, mask, n_heads,
                               mask_eps=-1e9, use_bf16_mxu=True):
    """query/key/value: [B, S, D]; mask: [B, S, S] (nonzero = attend) or None -> [B, S, D]."""
    B, S, D = query.shape
    assert D % n_heads == 0
    d_k = D // n_heads
    q_scale = 1.0 / math.sqrt(d_k)
    out_dtype = query.dtype
    compute_dtype = jnp.bfloat16 if use_bf16_mxu else jnp.float32
    wkey = "wt_mxu" if use_bf16_mxu else "wt"

    vmem_limit, proj_tiles, attn_tiles = _budgets()

    # 2-D activation views, cast once to the MXU dtype.  Identity is preserved so the
    # self-attention (q is k is v) fast path streams x a single time.
    x_q = query.reshape(B * S, D).astype(compute_dtype)
    if key is query:
        x_k = x_q
    else:
        x_k = key.reshape(B * S, D).astype(compute_dtype)
    if value is query:
        x_v = x_q
    elif value is key:
        x_v = x_k
    else:
        x_v = value.reshape(B * S, D).astype(compute_dtype)

    pq, pk, pv, po = params
    q2, k2, v2 = qkv_proj_pallas(
        x_q, x_k, x_v,
        pq[wkey], pq["b"], pk[wkey], pk["b"], pv[wkey], pv["b"], q_scale,
        out_dtype=compute_dtype, compute_dtype=compute_dtype,
        vmem_limit=vmem_limit, **proj_tiles)

    # [B*S, D] -> [B*H, S, d_k]: heads become a parallel grid axis of the attention
    # kernel (no sub-128 lane slicing / concatenate inside the kernel).
    def to_heads(x):
        return (x.reshape(B, S, n_heads, d_k)
                 .transpose(0, 2, 1, 3)
                 .reshape(B * n_heads, S, d_k))

    ctx = mha_pallas(to_heads(q2), to_heads(k2), to_heads(v2), mask,
                     n_heads=n_heads, mask_eps=mask_eps,
                     compute_dtype=compute_dtype, vmem_limit=vmem_limit,
                     **attn_tiles)

    ctx2 = (ctx.reshape(B, n_heads, S, d_k)
               .transpose(0, 2, 1, 3)
               .reshape(B * S, D))

    out = linear_pallas(ctx2, po[wkey], po["b"], out_dtype=out_dtype,
                        compute_dtype=compute_dtype, vmem_limit=vmem_limit,
                        **proj_tiles)
    return out.reshape(B, S, D)


# ----------------------------------------------------------------------------
# References: pure-f32 semantics, and an MXU-precision-aware mirror (bf16 dot
# operands + bf16 q/k/v/ctx intermediates, f32 accumulation) for tight checks.
# ----------------------------------------------------------------------------
def reference_forward(params, query, key, value, mask, n_heads, mask_eps=-1e9):
    B, S, D = query.shape
    d_k = D // n_heads

    def lin(p, x):
        return x @ p["wt"] + p["b"]

    def proj(p, x):
        return lin(p, x.reshape(B * S, D)).reshape(B, S, n_heads, d_k).transpose(0, 2, 1, 3)

    q, k, v = proj(params[0], query), proj(params[1], key), proj(params[2], value)
    scores = jnp.einsum("bhqd,bhkd->bhqk", q, k) / math.sqrt(d_k)
    if mask is not None:
        scores = jnp.where(mask[:, None, :, :] == 0, mask_eps, scores)
    p = jax.nn.softmax(scores, axis=-1)
    x = jnp.einsum("bhqk,bhkd->bhqd", p, v)
    x = x.transpose(0, 2, 1, 3).reshape(B * S, D)
    return lin(params[3], x).reshape(B, S, D)


def reference_forward_mxu(params, query, key, value, mask, n_heads,
                          mask_eps=-1e9, mxu_dtype=jnp.bfloat16):
    B, S, D = query.shape
    d_k = D // n_heads
    q_scale = 1.0 / math.sqrt(d_k)

    def lin(p, x, scale=None):
        y = jnp.dot(x.astype(mxu_dtype), p["wt"].astype(mxu_dtype),
                    preferred_element_type=jnp.float32) + p["b"]
        if scale is not None:
            y = y * scale
        return y.astype(mxu_dtype)

    def heads(x):
        return x.reshape(B, S, n_heads, d_k).transpose(0, 2, 1, 3)

    q = heads(lin(params[0], query.reshape(B * S, D), q_scale))
    k = heads(lin(params[1], key.reshape(B * S, D)))
    v = heads(lin(params[2], value.reshape(B * S, D)))
    s = jnp.einsum("bhqd,bhkd->bhqk", q, k, preferred_element_type=jnp.float32)
    if mask is not None:
        s = jnp.where(mask[:, None, :, :] == 0, mask_eps, s)
    p = jax.nn.softmax(s, axis=-1)
    ctx = jnp.einsum("bhqk,bhkd->bhqd", p.astype(mxu_dtype), v,
                     preferred_element_type=jnp.float32).astype(mxu_dtype)
    ctx = ctx.transpose(0, 2, 1, 3).reshape(B * S, D)
    out = (jnp.dot(ctx, params[3]["wt"].astype(mxu_dtype),
                   preferred_element_type=jnp.float32) + params[3]["b"])
    return out.astype(query.dtype).reshape(B, S, D)


if __name__ == "__main__":
    B, S, D, H = 2, 8, 32, 4
    root = jax.random.PRNGKey(0)
    kp, kq, kk, kv = jax.random.split(root, 4)

    params = init_params(kp, H, D)
    query = jax.random.normal(kq, (B, S, D), jnp.float32)
    key_t = jax.random.normal(kk, (B, S, D), jnp.float32)
    value = jax.random.normal(kv, (B, S, D), jnp.float32)
    # causal mask, [B, S, S]; 1 = attend, 0 = masked
    mask = jnp.tril(jnp.ones((S, S), jnp.float32))[None].repeat(B, axis=0)

    def check(name, q_, k_, v_, m_):
        out = jax.block_until_ready(
            abstract_attention_forward(params, q_, k_, v_, m_, H))
        assert out.shape == (B, S, D), f"{name}: bad shape {out.shape}"
        ref_mxu = reference_forward_mxu(params, q_, k_, v_, m_, H)
        ref_f32 = reference_forward(params, q_, k_, v_, m_, H)
        assert jnp.allclose(out, ref_mxu, atol=1e-2, rtol=1e-2), \
            f"{name}: mismatch vs bf16-MXU-aware reference"
        assert jnp.allclose(out, ref_f32, atol=7e-2, rtol=7e-2), \
            f"{name}: mismatch vs f32 reference"

    check("masked cross-attention", query, key_t, value, mask)
    check("no-mask cross-attention", query, key_t, value, None)
    check("masked self-attention (shared-x fast path)", query, query, query, mask)

    print("KERNEL_OK")
</pallas_src>

<mosaic_0001>
module attributes {stable_mosaic.version = 11 : i64} {
  func.func @_qkv_proj_kernel(%arg0: i32, %arg1: i32, %arg2: i32, %arg3: memref<16x32xbf16, #tpu.memory_space<vmem>>, %arg4: memref<16x32xbf16, #tpu.memory_space<vmem>>, %arg5: memref<16x32xbf16, #tpu.memory_space<vmem>>, %arg6: memref<32x32xbf16, #tpu.memory_space<vmem>>, %arg7: memref<32x32xbf16, #tpu.memory_space<vmem>>, %arg8: memref<32x32xbf16, #tpu.memory_space<vmem>>, %arg9: memref<1x32xf32, #tpu.memory_space<vmem>>, %arg10: memref<1x32xf32, #tpu.memory_space<vmem>>, %arg11: memref<1x32xf32, #tpu.memory_space<vmem>>, %arg12: memref<16x32xbf16, #tpu.memory_space<vmem>>, %arg13: memref<16x32xbf16, #tpu.memory_space<vmem>>, %arg14: memref<16x32xbf16, #tpu.memory_space<vmem>>, %arg15: memref<16x32xf32, #tpu.memory_space<vmem>>, %arg16: memref<16x32xf32, #tpu.memory_space<vmem>>, %arg17: memref<16x32xf32, #tpu.memory_space<vmem>>) attributes {dimension_semantics = [#tpu.dimension_semantics<parallel>, #tpu.dimension_semantics<parallel>, #tpu.dimension_semantics<arbitrary>], iteration_bounds = array<i64: 1, 1, 1>, scalar_prefetch = 0 : i64, scratch_operands = 3 : i64, tpu.core_type = #tpu.core_type<tc>, window_params = [{transform_indices = @transform_0, window_bounds = array<i64: 16, 32>}, {transform_indices = @transform_1, window_bounds = array<i64: 16, 32>}, {transform_indices = @transform_2, window_bounds = array<i64: 16, 32>}, {transform_indices = @transform_3, window_bounds = array<i64: 32, 32>}, {transform_indices = @transform_4, window_bounds = array<i64: 32, 32>}, {transform_indices = @transform_5, window_bounds = array<i64: 32, 32>}, {transform_indices = @transform_6, window_bounds = array<i64: 1, 32>}, {transform_indices = @transform_7, window_bounds = array<i64: 1, 32>}, {transform_indices = @transform_8, window_bounds = array<i64: 1, 32>}, {transform_indices = @transform_9, window_bounds = array<i64: 16, 32>}, {transform_indices = @transform_10, window_bounds = array<i64: 16, 32>}, {transform_indices = @transform_11, window_bounds = array<i64: 16, 32>}]} {
    %c0_i32 = arith.constant 0 : i32
    %0 = arith.cmpi eq, %arg2, %c0_i32 : i32
    %1 = arith.extui %0 : i1 to i32
    %c0_i32_0 = arith.constant 0 : i32
    %2 = arith.cmpi ne, %1, %c0_i32_0 : i32
    scf.if %2 {
      %cst_28 = arith.constant 0.000000e+00 : f32
      %24 = vector.broadcast %cst_28 : f32 to vector<16x32xf32>
      %c0_29 = arith.constant 0 : index
      %c0_30 = arith.constant 0 : index
      %25 = vector.load %arg15[%c0_29, %c0_30] : memref<16x32xf32, #tpu.memory_space<vmem>>, vector<16x32xf32>
      tpu.vector_store %arg15[%c0_29, %c0_30], %24 {strides = array<i32>} : memref<16x32xf32, #tpu.memory_space<vmem>>, vector<16x32xf32>,
      %cst_31 = arith.constant 0.000000e+00 : f32
      %26 = vector.broadcast %cst_31 : f32 to vector<16x32xf32>
      %c0_32 = arith.constant 0 : index
      %c0_33 = arith.constant 0 : index
      %27 = vector.load %arg16[%c0_32, %c0_33] : memref<16x32xf32, #tpu.memory_space<vmem>>, vector<16x32xf32>
      tpu.vector_store %arg16[%c0_32, %c0_33], %26 {strides = array<i32>} : memref<16x32xf32, #tpu.memory_space<vmem>>, vector<16x32xf32>,
      %cst_34 = arith.constant 0.000000e+00 : f32
      %28 = vector.broadcast %cst_34 : f32 to vector<16x32xf32>
      %c0_35 = arith.constant 0 : index
      %c0_36 = arith.constant 0 : index
      %29 = vector.load %arg17[%c0_35, %c0_36] : memref<16x32xf32, #tpu.memory_space<vmem>>, vector<16x32xf32>
      tpu.vector_store %arg17[%c0_35, %c0_36], %28 {strides = array<i32>} : memref<16x32xf32, #tpu.memory_space<vmem>>, vector<16x32xf32>,
    } else {
    }
    %c0 = arith.constant 0 : index
    %c0_1 = arith.constant 0 : index
    %3 = vector.load %arg3[%c0, %c0_1] : memref<16x32xbf16, #tpu.memory_space<vmem>>, vector<16x32xbf16>
    %c0_2 = arith.constant 0 : index
    %c0_3 = arith.constant 0 : index
    %4 = vector.load %arg4[%c0_2, %c0_3] : memref<16x32xbf16, #tpu.memory_space<vmem>>, vector<16x32xbf16>
    %c0_4 = arith.constant 0 : index
    %c0_5 = arith.constant 0 : index
    %5 = vector.load %arg5[%c0_4, %c0_5] : memref<16x32xbf16, #tpu.memory_space<vmem>>, vector<16x32xbf16>
    %c0_6 = arith.constant 0 : index
    %c0_7 = arith.constant 0 : index
    %6 = vector.load %arg15[%c0_6, %c0_7] : memref<16x32xf32, #tpu.memory_space<vmem>>, vector<16x32xf32>
    %c0_8 = arith.constant 0 : index
    %c0_9 = arith.constant 0 : index
    %7 = vector.load %arg6[%c0_8, %c0_9] : memref<32x32xbf16, #tpu.memory_space<vmem>>, vector<32x32xbf16>
    %cst = arith.constant dense<0.000000e+00> : vector<16x32xf32>
    %8 = tpu.matmul %3, %7, %cst {dimension_numbers = #tpu.dot_dimension_numbers<[1], [0], [0], [1], [0, 0, 1, 1], [], []>} : vector<16x32xbf16>, vector<32x32xbf16>, vector<16x32xf32> -> vector<16x32xf32>
    %9 = arith.addf %6, %8 : vector<16x32xf32>
    %c0_10 = arith.constant 0 : index
    %c0_11 = arith.constant 0 : index
    %10 = vector.load %arg15[%c0_10, %c0_11] : memref<16x32xf32, #tpu.memory_space<vmem>>, vector<16x32xf32>
    tpu.vector_store %arg15[%c0_10, %c0_11], %9 {strides = array<i32>} : memref<16x32xf32, #tpu.memory_space<vmem>>, vector<16x32xf32>,
    %c0_12 = arith.constant 0 : index
    %c0_13 = arith.constant 0 : index
    %11 = vector.load %arg16[%c0_12, %c0_13] : memref<16x32xf32, #tpu.memory_space<vmem>>, vector<16x32xf32>
    %c0_14 = arith.constant 0 : index
    %c0_15 = arith.constant 0 : index
    %12 = vector.load %arg7[%c0_14, %c0_15] : memref<32x32xbf16, #tpu.memory_space<vmem>>, vector<32x32xbf16>
    %cst_16 = arith.constant dense<0.000000e+00> : vector<16x32xf32>
    %13 = tpu.matmul %4, %12, %cst_16 {dimension_numbers = #tpu.dot_dimension_numbers<[1], [0], [0], [1], [0, 0, 1, 1], [], []>} : vector<16x32xbf16>, vector<32x32xbf16>, vector<16x32xf32> -> vector<16x32xf32>
    %14 = arith.addf %11, %13 : vector<16x32xf32>
    %c0_17 = arith.constant 0 : index
    %c0_18 = arith.constant 0 : index
    %15 = vector.load %arg16[%c0_17, %c0_18] : memref<16x32xf32, #tpu.memory_space<vmem>>, vector<16x32xf32>
    tpu.vector_store %arg16[%c0_17, %c0_18], %14 {strides = array<i32>} : memref<16x32xf32, #tpu.memory_space<vmem>>, vector<16x32xf32>,
    %c0_19 = arith.constant 0 : index
    %c0_20 = arith.constant 0 : index
    %16 = vector.load %arg17[%c0_19, %c0_20] : memref<16x32xf32, #tpu.memory_space<vmem>>, vector<16x32xf32>
    %c0_21 = arith.constant 0 : index
    %c0_22 = arith.constant 0 : index
    %17 = vector.load %arg8[%c0_21, %c0_22] : memref<32x32xbf16, #tpu.memory_space<vmem>>, vector<32x32xbf16>
    %cst_23 = arith.constant dense<0.000000e+00> : vector<16x32xf32>
    %18 = tpu.matmul %5, %17, %cst_23 {dimension_numbers = #tpu.dot_dimension_numbers<[1], [0], [0], [1], [0, 0, 1, 1], [], []>} : vector<16x32xbf16>, vector<32x32xbf16>, vector<16x32xf32> -> vector<16x32xf32>
    %19 = arith.addf %16, %18 : vector<16x32xf32>
    %c0_24 = arith.constant 0 : index
    %c0_25 = arith.constant 0 : index
    %20 = vector.load %arg17[%c0_24, %c0_25] : memref<16x32xf32, #tpu.memory_space<vmem>>, vector<16x32xf32>
    tpu.vector_store %arg17[%c0_24, %c0_25], %19 {strides = array<i32>} : memref<16x32xf32, #tpu.memory_space<vmem>>, vector<16x32xf32>,
    %c0_i32_26 = arith.constant 0 : i32
    %21 = arith.cmpi eq, %arg2, %c0_i32_26 : i32
    %22 = arith.extui %21 : i1 to i32
    %c0_i32_27 = arith.constant 0 : i32
    %23 = arith.cmpi ne, %22, %c0_i32_27 : i32
    scf.if %23 {
      %c0_28 = arith.constant 0 : index
      %c0_29 = arith.constant 0 : index
      %24 = vector.load %arg15[%c0_28, %c0_29] : memref<16x32xf32, #tpu.memory_space<vmem>>, vector<16x32xf32>
      %c0_30 = arith.constant 0 : index
      %c0_31 = arith.constant 0 : index
      %25 = vector.load %arg9[%c0_30, %c0_31] : memref<1x32xf32, #tpu.memory_space<vmem>>, vector<1x32xf32>
      %26 = vector.broadcast %25 : vector<1x32xf32> to vector<16x32xf32>
      %27 = arith.addf %24, %26 : vector<16x32xf32>
      %cst_32 = arith.constant 0.353553385 : f32
      %28 = vector.broadcast %cst_32 : f32 to vector<16x32xf32>
      %29 = arith.mulf %27, %28 : vector<16x32xf32>
      %30 = arith.truncf %29 : vector<16x32xf32> to vector<16x32xbf16>
      %c0_33 = arith.constant 0 : index
      %c0_34 = arith.constant 0 : index
      %31 = vector.load %arg12[%c0_33, %c0_34] : memref<16x32xbf16, #tpu.memory_space<vmem>>, vector<16x32xbf16>
      tpu.vector_store %arg12[%c0_33, %c0_34], %30 {strides = array<i32>} : memref<16x32xbf16, #tpu.memory_space<vmem>>, vector<16x32xbf16>,
      %c0_35 = arith.constant 0 : index
      %c0_36 = arith.constant 0 : index
      %32 = vector.load %arg16[%c0_35, %c0_36] : memref<16x32xf32, #tpu.memory_space<vmem>>, vector<16x32xf32>
      %c0_37 = arith.constant 0 : index
      %c0_38 = arith.constant 0 : index
      %33 = vector.load %arg10[%c0_37, %c0_38] : memref<1x32xf32, #tpu.memory_space<vmem>>, vector<1x32xf32>
      %34 = vector.broadcast %33 : vector<1x32xf32> to vector<16x32xf32>
      %35 = arith.addf %32, %34 : vector<16x32xf32>
      %36 = arith.truncf %35 : vector<16x32xf32> to vector<16x32xbf16>
      %c0_39 = arith.constant 0 : index
      %c0_40 = arith.constant 0 : index
      %37 = vector.load %arg13[%c0_39, %c0_40] : memref<16x32xbf16, #tpu.memory_space<vmem>>, vector<16x32xbf16>
      tpu.vector_store %arg13[%c0_39, %c0_40], %36 {strides = array<i32>} : memref<16x32xbf16, #tpu.memory_space<vmem>>, vector<16x32xbf16>,
      %c0_41 = arith.constant 0 : index
      %c0_42 = arith.constant 0 : index
      %38 = vector.load %arg17[%c0_41, %c0_42] : memref<16x32xf32, #tpu.memory_space<vmem>>, vector<16x32xf32>
      %c0_43 = arith.constant 0 : index
      %c0_44 = arith.constant 0 : index
      %39 = vector.load %arg11[%c0_43, %c0_44] : memref<1x32xf32, #tpu.memory_space<vmem>>, vector<1x32xf32>
      %40 = vector.broadcast %39 : vector<1x32xf32> to vector<16x32xf32>
      %41 = arith.addf %38, %40 : vector<16x32xf32>
      %42 = arith.truncf %41 : vector<16x32xf32> to vector<16x32xbf16>
      %c0_45 = arith.constant 0 : index
      %c0_46 = arith.constant 0 : index
      %43 = vector.load %arg14[%c0_45, %c0_46] : memref<16x32xbf16, #tpu.memory_space<vmem>>, vector<16x32xbf16>
      tpu.vector_store %arg14[%c0_45, %c0_46], %42 {strides = array<i32>} : memref<16x32xbf16, #tpu.memory_space<vmem>>, vector<16x32xbf16>,
    } else {
    }
    return
  }
  func.func @transform_0(%arg0: i32, %arg1: i32, %arg2: i32) -> (i32, i32) {
    %c0_i32 = arith.constant 0 : i32
    return %arg0, %arg2 : i32, i32
  }
  func.func @transform_1(%arg0: i32, %arg1: i32, %arg2: i32) -> (i32, i32) {
    %c0_i32 = arith.constant 0 : i32
    return %arg0, %arg2 : i32, i32
  }
  func.func @transform_2(%arg0: i32, %arg1: i32, %arg2: i32) -> (i32, i32) {
    %c0_i32 = arith.constant 0 : i32
    return %arg0, %arg2 : i32, i32
  }
  func.func @transform_3(%arg0: i32, %arg1: i32, %arg2: i32) -> (i32, i32) {
    %c0_i32 = arith.constant 0 : i32
    return %arg2, %arg1 : i32, i32
  }
  func.func @transform_4(%arg0: i32, %arg1: i32, %arg2: i32) -> (i32, i32) {
    %c0_i32 = arith.constant 0 : i32
    return %arg2, %arg1 : i32, i32
  }
  func.func @transform_5(%arg0: i32, %arg1: i32, %arg2: i32) -> (i32, i32) {
    %c0_i32 = arith.constant 0 : i32
    return %arg2, %arg1 : i32, i32
  }
  func.func @transform_6(%arg0: i32, %arg1: i32, %arg2: i32) -> (i32, i32) {
    %c0_i32 = arith.constant 0 : i32
    %c0_i32_0 = arith.constant 0 : i32
    return %c0_i32, %arg1 : i32, i32
  }
  func.func @transform_7(%arg0: i32, %arg1: i32, %arg2: i32) -> (i32, i32) {
    %c0_i32 = arith.constant 0 : i32
    %c0_i32_0 = arith.constant 0 : i32
    return %c0_i32, %arg1 : i32, i32
  }
  func.func @transform_8(%arg0: i32, %arg1: i32, %arg2: i32) -> (i32, i32) {
    %c0_i32 = arith.constant 0 : i32
    %c0_i32_0 = arith.constant 0 : i32
    return %c0_i32, %arg1 : i32, i32
  }
  func.func @transform_9(%arg0: i32, %arg1: i32, %arg2: i32) -> (i32, i32) {
    %c0_i32 = arith.constant 0 : i32
    return %arg0, %arg1 : i32, i32
  }
  func.func @transform_10(%arg0: i32, %arg1: i32, %arg2: i32) -> (i32, i32) {
    %c0_i32 = arith.constant 0 : i32
    return %arg0, %arg1 : i32, i32
  }
  func.func @transform_11(%arg0: i32, %arg1: i32, %arg2: i32) -> (i32, i32) {
    %c0_i32 = arith.constant 0 : i32
    return %arg0, %arg1 : i32, i32
  }
}

</mosaic_0001>

<bundles_post_ra>
// kernel: tpu_custom_call.1
= control target key start
LH: loop header
LB: loop body
LE: loop exit
PB: predicated region body
PF: predicated region fallthrough
CT: control target
= control target key end

     0   :  { %17 = vsyncpa [#allocation6], 0  ;;  %s978_s0 = inlined_call_operand.hbm [shape: bf16[16,32], index: 0, kind: input, shape index: {}]   ;;  %s979_s1 = inlined_call_operand.hbm [shape: bf16[16,32], index: 1, kind: input, shape index: {}]   ;;  %s980_s2 = inlined_call_operand.hbm [shape: bf16[16,32], index: 2, kind: input, shape index: {}]   ;;  %s981_s3 = inlined_call_operand.hbm [shape: bf16[32,32], index: 3, kind: input, shape index: {}]   ;;  %s982_s4 = inlined_call_operand.hbm [shape: bf16[32,32], index: 4, kind: input, shape index: {}]   ;;  %s983_s5 = inlined_call_operand.vmem [shape: bf16[32,32], index: 5, kind: input, shape index: {}]   ;;  %s984_s6 = inlined_call_operand.vmem [shape: f32[1,32], index: 6, kind: input, shape index: {}]   ;;  %s985_s7 = inlined_call_operand.vmem [shape: f32[1,32], index: 7, kind: input, shape index: {}]   ;;  %s986_s8 = inlined_call_operand.vmem [shape: f32[1,32], index: 8, kind: input, shape index: {}]   ;;  %s987_s9 = inlined_call_operand.hbm [shape: bf16[16,32], index: 9, kind: output, shape index: {0}]   ;;  %s988_s10 = inlined_call_operand.hbm [shape: bf16[16,32], index: 10, kind: output, shape index: {1}]   ;;  %s989_s11 = inlined_call_operand.hbm [shape: bf16[16,32], index: 11, kind: output, shape index: {2}]  }
   0x1   :  { %18 = vsyncpa [#allocation9], 0 }
   0x2   :  { %19 = vsyncpa [#allocation12], 0 }
   0x3   :  { %20 = vsyncpa [#allocation7], 0 }
   0x4   :  { %21 = vsyncpa [#allocation16], 0  ;;  %s723_s17 = smov [#allocation8]   ;;  %s724_s19 = smov [#allocation11]  }
   0x5   :  { %s39_s18 = sshll.u32 %s723_s17, 4  ;;  %s63_s20 = sshll.u32 %s724_s19, 4  ;;  %s40_s18 = int_to_ptr.vmem [resolvable:$true] %s39_s18  ;;  %s795_s20 = int_to_ptr.vmem [resolvable:$true] %s63_s20 }
   0x6   :  { %s537_s23 = scalar_lea.hbm %s979_s1, 128 }
   0x7   :  { %p538_p0 = scmp.ne.s32.totalorder %s979_s1, %s537_s23  ;;  %p541_p1 = scmp.lt.u32.totalorder %s537_s23, %s979_s1 }
   0x9   :  { %p543_p2 = pnand %p541_p1, %p538_p0 }
   0xb   :  { %546 = shalt.err (!%p543_p2)
}
   0xc   :  { %s547_s28 = scalar_lea.vmem %s40_s18, 128  ;;  %p552_p4 = scmp.lt.s32.totalorder %s40_s18, %s40_s18 }
   0xd   :  { %p548_p3 = scmp.ne.s32.totalorder %s40_s18, %s547_s28  ;;  %p553_p5 = scmp.lt.s32.totalorder %s547_s28, %s547_s28 }
   0xf   :  { %p554_p6 = por %p553_p5, %p552_p4 }
  0x11   :  { %p555_p7 = pnand %p554_p6, %p548_p3 }
  0x13   :  { %558 = shalt.err (!%p555_p7)
}
  0x14   :  { %s725_s29 = smov 64   ;;  %s726_s30 = smov 4  }
  0x15   :  { %45 = dma.hbm_to_vmem [thread:$0]  %s979_s1, 128, %s40_s18, [#allocation9], %s725_s29, %s725_s29, %s726_s30  }
  0x16   :  { %s559_s16 = scalar_lea.hbm %s981_s3, 256 }
  0x17   :  { %p560_p8 = scmp.ne.s32.totalorder %s981_s3, %s559_s16  ;;  %p563_p9 = scmp.lt.u32.totalorder %s559_s16, %s981_s3 }
  0x19   :  { %p565_p10 = pnand %p563_p9, %p560_p8 }
  0x1b   :  { %568 = shalt.err (!%p565_p10)
}
  0x1c   :  { %s569_s23 = scalar_lea.vmem %s795_s20, 256  ;;  %p574_p12 = scmp.lt.s32.totalorder %s795_s20, %s795_s20 }
  0x1d   :  { %p570_p11 = scmp.ne.s32.totalorder %s795_s20, %s569_s23  ;;  %p575_p13 = scmp.lt.s32.totalorder %s569_s23, %s569_s23 }
  0x1f   :  { %p576_p0 = por %p575_p13, %p574_p12 }
  0x21   :  { %p577_p1 = pnand %p576_p0, %p570_p11 }
  0x23   :  { %580 = shalt.err (!%p577_p1)
}
  0x24   :  { %69 = dma.hbm_to_vmem [thread:$0]  %s981_s3, 256, %s795_s20, [#allocation12], %s725_s29, %s725_s29, %s726_s30  }
  0x25   :  { %s727_s24 = smov [#allocation5]   ;;  %s728_s26 = smov [#allocation10]  }
  0x26   :  { %s27_s25 = sshll.u32 %s727_s24, 4  ;;  %s51_s27 = sshll.u32 %s728_s26, 4  ;;  %s28_s25 = int_to_ptr.vmem [resolvable:$true] %s27_s25  ;;  %s832_s27 = int_to_ptr.vmem [resolvable:$true] %s51_s27 }
  0x27   :  { %s581_s13 = scalar_lea.hbm %s978_s0, 128 }
  0x28   :  { %p582_p2 = scmp.ne.s32.totalorder %s978_s0, %s581_s13  ;;  %p585_p3 = scmp.lt.u32.totalorder %s581_s13, %s978_s0 }
  0x2a   :  { %p587_p4 = pnand %p585_p3, %p582_p2 }
  0x2c   :  { %590 = shalt.err (!%p587_p4)
}
  0x2d   :  { %s591_s3 = scalar_lea.vmem %s28_s25, 128  ;;  %p596_p6 = scmp.lt.s32.totalorder %s28_s25, %s28_s25 }
  0x2e   :  { %p592_p5 = scmp.ne.s32.totalorder %s28_s25, %s591_s3  ;;  %p597_p7 = scmp.lt.s32.totalorder %s591_s3, %s591_s3 }
  0x30   :  { %p598_p8 = por %p597_p7, %p596_p6 }
  0x32   :  { %p599_p9 = pnand %p598_p8, %p592_p5 }
  0x34   :  { %602 = shalt.err (!%p599_p9)
}
  0x35   :  { %33 = dma.hbm_to_vmem [thread:$0]  %s978_s0, 128, %s28_s25, [#allocation6], %s725_s29, %s725_s29, %s726_s30  }
  0x36   :  { %s603_s23 = scalar_lea.hbm %s980_s2, 128 }
  0x37   :  { %p604_p10 = scmp.ne.s32.totalorder %s980_s2, %s603_s23  ;;  %p607_p11 = scmp.lt.u32.totalorder %s603_s23, %s980_s2 }
  0x39   :  { %p609_p12 = pnand %p607_p11, %p604_p10 }
  0x3b   :  { %612 = shalt.err (!%p609_p12)
}
  0x3c   :  { %s613_s28 = scalar_lea.vmem %s832_s27, 128  ;;  %p618_p0 = scmp.lt.s32.totalorder %s832_s27, %s832_s27 }
  0x3d   :  { %p614_p13 = scmp.ne.s32.totalorder %s832_s27, %s613_s28  ;;  %p619_p1 = scmp.lt.s32.totalorder %s613_s28, %s613_s28 }
  0x3f   :  { %p620_p2 = por %p619_p1, %p618_p0 }
  0x41   :  { %p621_p3 = pnand %p620_p2, %p614_p13 }
  0x43   :  { %624 = shalt.err (!%p621_p3)
}
  0x44   :  { %57 = dma.hbm_to_vmem [thread:$0]  %s980_s2, 128, %s832_s27, [#allocation9], %s725_s29, %s725_s29, %s726_s30  }
  0x45   :  { %s729_s12 = smov [#allocation13]   ;;  %s625_s16 = scalar_lea.hbm %s982_s4, 256 }
  0x46   :  { %s75_s13 = sshll.u32 %s729_s12, 4  ;;  %p626_p4 = scmp.ne.s32.totalorder %s982_s4, %s625_s16  ;;  %s76_s13 = int_to_ptr.vmem [resolvable:$true] %s75_s13 }
  0x47   :  { %p629_p5 = scmp.lt.u32.totalorder %s625_s16, %s982_s4 }
  0x49   :  { %p631_p6 = pnand %p629_p5, %p626_p4 }
  0x4b   :  { %634 = shalt.err (!%p631_p6)
}
  0x4c   :  { %s635_s21 = scalar_lea.vmem %s76_s13, 256  ;;  %p640_p8 = scmp.lt.s32.totalorder %s76_s13, %s76_s13 }
  0x4d   :  { %p636_p7 = scmp.ne.s32.totalorder %s76_s13, %s635_s21  ;;  %p641_p9 = scmp.lt.s32.totalorder %s635_s21, %s635_s21 }
  0x4f   :  { %p642_p10 = por %p641_p9, %p640_p8 }
  0x51   :  { %p643_p11 = pnand %p642_p10, %p636_p7 }
  0x53   :  { %646 = shalt.err (!%p643_p11)
}
  0x54   :  { %81 = dma.hbm_to_vmem [thread:$0]  %s982_s4, 256, %s76_s13, [#allocation12], %s725_s29, %s725_s29, %s726_s30  }
  0x55   :  { %713 = dma.done.wait [#allocation6], 128  }
  0x56   :  { %714 = vsyncadd [#allocation6], 4294967168 }
  0x57   :  { %715 = dma.done.wait [#allocation9], 256  }
  0x58   :  { %716 = vsyncadd [#allocation9], 4294967040 }
  0x59   :  { %717 = dma.done.wait [#allocation12], 512  }
  0x5a   :  { %718 = vsyncadd [#allocation12], 4294966784  ;;  %vm110_vm0 = vcmask 261120   ;;  %v730_v0 = vmov 0.0   ;;  %vm731_vm1 = vmmov 0   ;;  %v528_v1 = vld [vmem:[#allocation11] sm:$0xff]  }
  0x5b   :  { %492 = vmatprep.subr.bf16.mxu0 %v730_v0  ;;  %500 = vmatprep.subr.bf16.mxu1 %v730_v0  ;;  %111 = vst.msk [vmem:[#allocation2] sm:$0xff] %vm110_vm0, %v730_v0  ;;  %112 = vst.msk [vmem:[#allocation2 + $0x8] sm:$0xff] %vm110_vm0, %v730_v0  ;;  %v529_v2 = vld [vmem:[#allocation11 + $0x8] sm:$0xff]   ;;  %v530_v3 = vld [vmem:[#allocation13] sm:$0xff]   ;;  %vm361_vm2 = vcmask 257024   ;;  %s734_s13 = smov [#allocation17]  }
  0x5c   :  { %113 = vst.msk [vmem:[#allocation3] sm:$0xff] %vm110_vm0, %v730_v0  ;;  %114 = vst.msk [vmem:[#allocation3 + $0x8] sm:$0xff] %vm110_vm0, %v730_v0  ;;  %496 = vmatprep.mubr.msk.bf16.mxu0 %vm731_vm1, %v730_v0  ;;  %504 = vmatprep.mubr.msk.bf16.mxu1 %vm731_vm1, %v730_v0  ;;  %v531_v4 = vld [vmem:[#allocation5] sm:$0xff]   ;;  %v533_v5 = vld [vmem:[#allocation13 + $0x8] sm:$0xff]   ;;  %s923_s14 = sshll.u32 %s734_s13, 4  ;;  %s436_s14 = int_to_ptr.vmem [resolvable:$true] %s923_s14 }
  0x5d   :  { %115 = vst.msk [vmem:[#allocation4] sm:$0xff] %vm110_vm0, %v730_v0  ;;  %116 = vst.msk [vmem:[#allocation4 + $0x8] sm:$0xff] %vm110_vm0, %v730_v0  ;;  %493 = vmatpush3.bf16.msra.mxu0 %v528_v1  ;;  %501 = vmatpush3.bf16.msra.mxu1 %v530_v3  ;;  %v532_v6 = vld [vmem:[%s983_s5] sm:$0xff]   ;;  %v534_v7 = vld [vmem:[#allocation8] sm:$0xff]  }
  0x5e   :  { %494 = vmatprep.subr.bf16.mxu0 %v730_v0  ;;  %502 = vmatprep.subr.bf16.mxu1 %v730_v0  ;;  %v535_v8 = vld [vmem:[%s983_s5 + $0x8] sm:$0xff]   ;;  %v536_v9 = vld [vmem:[#allocation10] sm:$0xff]   ;;  %v468_v29 = vld [vmem:[%s984_s6] ss:$0 sm:$0xff]  ;;  %s732_s6 = smov [#allocation15]  }
  0x5f   :  { %v471_v33 = vld [vmem:[%s985_s7] ss:$0 sm:$0xff]  ;;  %s423_s28 = sshll.u32 %s732_s6, 4  ;;  %s733_s7 = smov [#allocation14]   ;;  %s424_s28 = int_to_ptr.vmem [resolvable:$true] %s423_s28 }
  0x60   :  { %s411_s0 = sshll.u32 %s733_s7, 4  ;;  %v474_v48 = vld [vmem:[%s986_s8] ss:$0 sm:$0xff]  ;;  %s647_s15 = scalar_lea.vmem %s424_s28, 128  ;;  %s919_s0 = int_to_ptr.vmem [resolvable:$true] %s411_s0 }
  0x61   :  { %495 = vmatpush3.bf16.msra.mxu0 %v529_v2  ;;  %503 = vmatpush3.bf16.msra.mxu1 %v533_v5  ;;  %p648_p12 = scmp.ne.s32.totalorder %s424_s28, %s647_s15  ;;  %p652_p13 = scmp.lt.s32.totalorder %s424_s28, %s424_s28 }
  0x62   :  { %508 = vmatprep.subr.bf16.mxu0 %v730_v0  ;;  %v123_v10 = vld [vmem:[#allocation2] sm:$0xff]  ;;  %v124_v12 = vld [vmem:[#allocation2 + $0x8] sm:$0xff]  ;;  %p653_p0 = scmp.lt.s32.totalorder %s647_s15, %s647_s15 }
  0x63   :  { %v195_v13 = vld [vmem:[#allocation3] sm:$0xff]  ;;  %v196_v18 = vld [vmem:[#allocation3 + $0x8] sm:$0xff] }
  0x64   :  { %497 = vmatmul.mubr.msk.bf16.vlgmr.msra.gmra.mrb[0].mxu0 %vm110_vm0, %v531_v4  ;;  %505 = vmatmul.mubr.msk.bf16.vlgmr.msra.gmra.mrb[0].mxu1 %vm110_vm0, %v534_v7  ;;  %v266_v26 = vld [vmem:[#allocation4] sm:$0xff]  ;;  %v267_v28 = vld [vmem:[#allocation4 + $0x8] sm:$0xff]  ;;  %p654_p1 = por %p653_p0, %p652_p13 }
  0x65   :  { %509 = vmatpush3.bf16.msra.mxu0 %v532_v6  ;;  %512 = vmatprep.mubr.msk.bf16.mxu0 %vm731_vm1, %v730_v0 }
  0x66   :  { %510 = vmatprep.subr.bf16.mxu0 %v730_v0  ;;  %p655_p2 = pnand %p654_p1, %p648_p12 }
  0x69   :  { %511 = vmatpush3.bf16.msra.mxu0 %v535_v8 }
  0x6c   :  { %513 = vmatmul.mubr.msk.bf16.vlgmr.msra.gmra.mrb[4].mxu0 %vm110_vm0, %v536_v9 }
 0x137   :  { %v184_v11 = vpop.f32.mrb[0].mxu0  ;;  %v255_v17 = vpop.f32.mrb[0].mxu1 }
 0x138   :  { %v191_v14 = vadd.f32 %v184_v11, %v123_v10  ;;  %v498_v15 = vpop.f32.mrb[1].mxu0  ;;  %v262_v21 = vadd.f32 %v255_v17, %v195_v13  ;;  %v506_v22 = vpop.f32.mrb[1].mxu1 }
 0x139   :  { %v187_v16 = vpop.f32.mrb[2].mxu0  ;;  %v258_v23 = vpop.f32.mrb[2].mxu1 }
 0x13a   :  { %193 = vst.msk [vmem:[#allocation2] sm:$0xff] %vm110_vm0, %v191_v14  ;;  %v192_v19 = vadd.f32 %v187_v16, %v124_v12  ;;  %v499_v20 = vpop.f32.mrb[3].mxu0  ;;  %264 = vst.msk [vmem:[#allocation3] sm:$0xff] %vm110_vm0, %v262_v21  ;;  %v263_v24 = vadd.f32 %v258_v23, %v196_v18  ;;  %v507_v25 = vpop.f32.mrb[3].mxu1 }
 0x13c   :  { %194 = vst.msk [vmem:[#allocation2 + $0x8] sm:$0xff] %vm110_vm0, %v192_v19  ;;  %265 = vst.msk [vmem:[#allocation3 + $0x8] sm:$0xff] %vm110_vm0, %v263_v24 }
 0x13f   :  { %v326_v27 = vpop.f32.mrb[4].mxu0 }
 0x140   :  { %v333_v30 = vadd.f32 %v326_v27, %v266_v26  ;;  %v514_v31 = vpop.f32.mrb[5].mxu0 }
 0x141   :  { %v329_v32 = vpop.f32.mrb[6].mxu0  ;;  %v340_v34 = vld [vmem:[#allocation2] sm:$0xff]  ;;  %v364_v38 = vld [vmem:[#allocation3] sm:$0xff] }
 0x142   :  { %335 = vst.msk [vmem:[#allocation4] sm:$0xff] %vm110_vm0, %v333_v30  ;;  %v334_v35 = vadd.f32 %v329_v32, %v267_v28  ;;  %v515_v36 = vpop.f32.mrb[7].mxu0  ;;  %v349_v37 = vadd.f32 %v468_v29, %v340_v34  ;;  %v373_v40 = vadd.f32 %v471_v33, %v364_v38 }
 0x143   :  { %v341_v39 = vld [vmem:[#allocation2 + $0x8] sm:$0xff]  ;;  %v365_v43 = vld [vmem:[#allocation3 + $0x8] sm:$0xff] }
 0x144   :  { %336 = vst.msk [vmem:[#allocation4 + $0x8] sm:$0xff] %vm110_vm0, %v334_v35  ;;  %v350_v41 = vadd.f32 %v468_v29, %v341_v39  ;;  %v351_v42 = vmul.f32 0.35355338, %v349_v37  ;;  %v374_v44 = vadd.f32 %v471_v33, %v365_v43  ;;  %v479_v45 = vpack.c.bf16 %v373_v40, %v373_v40 }
 0x146   :  { %v352_v46 = vmul.f32 0.35355338, %v350_v41  ;;  %v477_v47 = vpack.c.bf16 %v351_v42, %v351_v42  ;;  %v480_v49 = vpack.c.bf16 %v374_v44, %v374_v44  ;;  %383 = vst.msk [vmem:[#allocation15] sm:$0xf] %vm361_vm2, %v479_v45 }
 0x148   :  { %v478_v50 = vpack.c.bf16 %v352_v46, %v352_v46  ;;  %362 = vst.msk [vmem:[#allocation14] sm:$0xf] %vm361_vm2, %v477_v47  ;;  %384 = vst.msk [vmem:[#allocation15 + $0x4] sm:$0xf] %vm361_vm2, %v480_v49 }
 0x149   :  { %v385_v51 = vld [vmem:[#allocation4] sm:$0xff] }
 0x14a   :  { %363 = vst.msk [vmem:[#allocation14 + $0x4] sm:$0xf] %vm361_vm2, %v478_v50  ;;  %v394_v52 = vadd.f32 %v474_v48, %v385_v51 }
 0x14b   :  { %658 = shalt.err (!%p655_p2)
}
 0x14c   :  { %s659_s17 = scalar_lea.hbm %s988_s10, 128 }
 0x14d   :  { %p660_p3 = scmp.ne.s32.totalorder %s988_s10, %s659_s17  ;;  %p663_p4 = scmp.lt.u32.totalorder %s659_s17, %s988_s10 }
 0x14f   :  { %p665_p5 = pnand %p663_p4, %p660_p3 }
 0x151   :  { %668 = shalt.err (!%p665_p5)
}
 0x152   :  { %429 = dma.vmem_to_hbm [thread:$0]  %s424_s28, 128, %s988_s10, [#allocation16], %s725_s29, %s725_s29, %s726_s30   ;;  %v386_v53 = vld [vmem:[#allocation4 + $0x8] sm:$0xff] }
 0x153   :  { %s669_s4 = scalar_lea.vmem %s919_s0, 128  ;;  %p674_p7 = scmp.lt.s32.totalorder %s919_s0, %s919_s0 }
 0x154   :  { %p670_p6 = scmp.ne.s32.totalorder %s919_s0, %s669_s4  ;;  %p675_p8 = scmp.lt.s32.totalorder %s669_s4, %s669_s4 }
 0x156   :  { %p676_p9 = por %p675_p8, %p674_p7 }
 0x158   :  { %p677_p10 = pnand %p676_p9, %p670_p6 }
 0x15a   :  { %680 = shalt.err (!%p677_p10)
}
 0x15b   :  { %s681_s1 = scalar_lea.hbm %s987_s9, 128 }
 0x15c   :  { %p682_p11 = scmp.ne.s32.totalorder %s987_s9, %s681_s1  ;;  %p685_p12 = scmp.lt.u32.totalorder %s681_s1, %s987_s9 }
 0x15e   :  { %p687_p13 = pnand %p685_p12, %p682_p11 }
 0x160   :  { %690 = shalt.err (!%p687_p13)
}
 0x161   :  { %417 = dma.vmem_to_hbm [thread:$0]  %s919_s0, 128, %s987_s9, [#allocation7], %s725_s29, %s725_s29, %s726_s30   ;;  %v395_v54 = vadd.f32 %v474_v48, %v386_v53  ;;  %v481_v55 = vpack.c.bf16 %v394_v52, %v394_v52 }
 0x162   :  { %s691_s28 = scalar_lea.vmem %s436_s14, 128  ;;  %p696_p1 = scmp.lt.s32.totalorder %s436_s14, %s436_s14 }
 0x163   :  { %v482_v56 = vpack.c.bf16 %v395_v54, %v395_v54  ;;  %404 = vst.msk [vmem:[#allocation17] sm:$0xf] %vm361_vm2, %v481_v55  ;;  %p692_p0 = scmp.ne.s32.totalorder %s436_s14, %s691_s28  ;;  %p697_p2 = scmp.lt.s32.totalorder %s691_s28, %s691_s28 }
 0x165   :  { %405 = vst.msk [vmem:[#allocation17 + $0x4] sm:$0xf] %vm361_vm2, %v482_v56  ;;  %p698_p3 = por %p697_p2, %p696_p1 }
 0x167   :  { %p699_p4 = pnand %p698_p3, %p692_p0 }
 0x169   :  { %702 = shalt.err (!%p699_p4)
}
 0x16a   :  { %s703_s12 = scalar_lea.hbm %s989_s11, 128 }
 0x16b   :  { %p704_p5 = scmp.ne.s32.totalorder %s989_s11, %s703_s12  ;;  %p707_p6 = scmp.lt.u32.totalorder %s703_s12, %s989_s11 }
 0x16d   :  { %p709_p7 = pnand %p707_p6, %p704_p5 }
 0x16f   :  { %712 = shalt.err (!%p709_p7)
}
 0x170   :  { %441 = dma.vmem_to_hbm [thread:$0]  %s436_s14, 128, %s989_s11, [#allocation16], %s725_s29, %s725_s29, %s726_s30  }
 0x171   :  { %719 = dma.done.wait [#allocation7], 128  }
 0x172   :  { %720 = vsyncadd [#allocation7], 4294967168 }
 0x173   :  { %721 = dma.done.wait [#allocation16], 256  }
 0x174   :  { %722 = vsyncadd [#allocation16], 4294967040 }
 0x175   :  { %451 = vsyncpa [#allocation6], 1 }
 0x176   :  { %452 = vsyncpa [#allocation9], 1 }
 0x177   :  { %453 = vsyncpa [#allocation12], 1 }
 0x178   :  { %454 = vsyncpa [#allocation7], 1 }
 0x179   :  { %455 = vsyncpa [#allocation16], 1 }

</bundles_post_ra>
